<compile_context>
chip_gen: v5e
topology: v5e:2x2
jax: 0.10.0
libtpu: 0.0.40
codegen_flags: <defaults>
</compile_context>

<pallas_src>
import functools

import numpy as np
import jax
import jax.numpy as jnp
from jax.experimental import pallas as pl
from jax.experimental.pallas import tpu as pltpu

_NEG = -1e30  # mask value for conv positions outside a filter's valid range


def _round_up(x, m):
    return ((x + m - 1) // m) * m


def _choose_batch_tile(batch, t_pad, t_valid, e_dim, c_pad, out_w):
    """Batch tile: >=2 grid steps when possible (v7x dual-TC), multiple of 8,
    capped so the in-flight VMEM footprint stays well under the default scoped
    limit on all generations (incl. v7x's 64 MiB physical VMEM)."""
    if batch <= 8:
        return batch

    def vmem_bytes(tb):
        emb_tile = tb * t_pad * e_dim * 2            # bf16 emb block
        acc = tb * t_valid * c_pad * 4               # f32 conv accumulator
        mshift = tb * t_pad * c_pad * 4              # f32 per-shift matmul out
        out_tile = tb * out_w * 4                    # f32 packed output block
        return 2 * emb_tile + acc + mshift + 2 * out_tile

    tb = min(512, _round_up(-(-batch // 2), 8))      # >= 2 grid steps
    budget = 20 * 1024 * 1024
    while tb > 8 and vmem_bytes(tb) > budget:
        tb -= 8
    return tb


# ----------------------------------------------------------------------------
# Fused kernel: shift-stacked conv matmuls + mask/max-pool/ReLU + fc + fc1,
# single lane-dense packed store.
# ----------------------------------------------------------------------------
def _make_textcnn_kernel(max_fs, t_valid):
    def kernel(emb_ref, wconv_ref, bconv_ref, mask_ref,
               fcw_ref, fcb_ref, fc1w_ref, fc1b_ref, out_ref):
        tb, t_pad, e_dim = emb_ref.shape
        c_pad = wconv_ref.shape[2]

        # Un-sliced embedding as a single (TB*T_pad, E) bf16 matmul operand.
        emb2d = emb_ref[...].reshape(tb * t_pad, e_dim)

        # One MXU matmul per shift; the shifted accumulation happens on the
        # narrow (c_pad = 128 lane) output side.  No zero-init of acc.
        acc = None
        for s in range(max_fs):                       # static, small, unrolled
            m = jnp.dot(emb2d, wconv_ref[s],
                        preferred_element_type=jnp.float32)
            m = m.reshape(tb, t_pad, c_pad)
            part = m[:, s:s + t_valid, :]
            acc = part if acc is None else acc + part

        # Mask positions outside each filter's valid range, global max-pool
        # over time, add bias (constant in t), then ReLU (commutes with max).
        pooled = jnp.max(acc + mask_ref[...], axis=1) + bconv_ref[...]
        pooled = jnp.maximum(pooled, 0.0)             # (tb, c_pad) f32

        # fc (bf16 operands, f32 accumulate) then fc1 (tiny, f32).
        x = jnp.dot(pooled.astype(jnp.bfloat16), fcw_ref[...],
                    preferred_element_type=jnp.float32) + fcb_ref[...]
        y = jnp.dot(x, fc1w_ref[...],
                    preferred_element_type=jnp.float32) + fc1b_ref[...]

        # Single lane-dense (tb, out_w) store: [x | y_padded].
        out_ref[...] = jnp.concatenate([x, y], axis=-1).astype(out_ref.dtype)

    return kernel


# ----------------------------------------------------------------------------
# Public forward pass (matches CNN.forward; returns (x, fc1(x))).
# ----------------------------------------------------------------------------
def textcnn_forward(params, text):
    filter_sizes = params["filter_sizes"]
    num_filter = params["num_filter"]
    output_dim = params["output_dim"]
    max_fs, min_fs = max(filter_sizes), min(filter_sizes)

    w_conv = params["conv_w_packed"]       # (max_fs, E, C_pad) bf16
    b_conv = params["conv_b_packed"]       # (1, C_pad) f32
    fc_w = params["fc_w_packed"]           # (C_pad, 64) bf16
    fc_b = params["fc_b_packed"]           # (1, 64) f32
    fc1_w = params["fc1_w_packed"]         # (64, out_w-64) f32
    fc1_b = params["fc1_b_packed"]         # (1, out_w-64) f32

    c_pad = w_conv.shape[2]
    hidden = fc_w.shape[1]                 # 64
    out_w = hidden + fc1_w.shape[1]        # multiple of 128

    B, T = text.shape
    E = params["embedding"].shape[1]
    assert T >= max_fs, "sequence shorter than the largest filter"

    # Embedding lookup (plain JAX gather, bf16 table). Dropout == identity.
    # TODO(synk): fuse the gather into the kernel to drop one HBM round trip.
    emb = jnp.take(params["embedding"], text, axis=0)        # (B, T, E) bf16

    t_extra = max_fs - min_fs
    t_valid = T - min_fs + 1
    t_pad = T + t_extra

    TB = _choose_batch_tile(B, t_pad, t_valid, E, c_pad, out_w)
    B_pad = _round_up(B, TB)
    emb = jnp.pad(emb, ((0, B_pad - B), (0, t_extra), (0, 0)))

    # Per-filter valid-time mask (trace-time constant): NEG where the conv
    # position lies outside that filter's valid output range.
    mask_np = np.zeros((t_valid, c_pad), np.float32)
    for f, fs in enumerate(filter_sizes):
        valid = T - fs + 1
        mask_np[valid:, f * num_filter:(f + 1) * num_filter] = _NEG
    mask = jnp.asarray(mask_np)

    kernel = _make_textcnn_kernel(max_fs, t_valid)
    grid = (B_pad // TB,)

    in_specs = [
        pl.BlockSpec((TB, t_pad, E), lambda i: (i, 0, 0)),    # batch-tiled
        pl.BlockSpec(w_conv.shape, lambda i: (0, 0, 0)),      # resident weights
        pl.BlockSpec(b_conv.shape, lambda i: (0, 0)),
        pl.BlockSpec(mask.shape, lambda i: (0, 0)),
        pl.BlockSpec(fc_w.shape, lambda i: (0, 0)),
        pl.BlockSpec(fc_b.shape, lambda i: (0, 0)),
        pl.BlockSpec(fc1_w.shape, lambda i: (0, 0)),
        pl.BlockSpec(fc1_b.shape, lambda i: (0, 0)),
    ]

    packed = pl.pallas_call(
        kernel,
        out_shape=jax.ShapeDtypeStruct((B_pad, out_w), jnp.float32),
        grid_spec=pltpu.PrefetchScalarGridSpec(
            num_scalar_prefetch=0,
            grid=grid,
            in_specs=in_specs,
            out_specs=pl.BlockSpec((TB, out_w), lambda i: (i, 0)),
        ),
        compiler_params=pltpu.CompilerParams(
            dimension_semantics=("parallel",)),
    )(emb, w_conv, b_conv, mask, fc_w, fc_b, fc1_w, fc1_b)

    x = packed[:B, :hidden]
    y = packed[:B, hidden:hidden + output_dim]
    return x, y


# ----------------------------------------------------------------------------
# Pure-JAX reference (same parameter values, different computation path).
# ----------------------------------------------------------------------------
def textcnn_reference(params, text):
    emb = jnp.take(params["embedding"], text, axis=0).astype(jnp.float32)
    B, T, E = emb.shape
    pooled = []
    for fs, w, b in zip(params["filter_sizes"], params["conv_w_raw"],
                        params["conv_b_raw"]):
        t_out = T - fs + 1
        windows = jnp.stack([emb[:, s:s + t_out, :] for s in range(fs)],
                            axis=2)                               # (B,T_out,fs,E)
        conv = jnp.einsum("btse,sef->btf", windows, w) + b.reshape(1, 1, -1)
        pooled.append(jnp.max(jax.nn.relu(conv), axis=1))          # (B, F)
    cat = jnp.concatenate(pooled, axis=-1)
    x = cat @ params["fc_w_raw"] + params["fc_b_raw"]
    y = x @ params["fc1_w_raw"] + params["fc1_b_raw"]
    return x, y


# ----------------------------------------------------------------------------
# Deterministic init. Torch layouts are re-laid-out for the kernel:
#   Conv2d weight (F,1,fs,E) -> (fs,E,F), stacked lane-dense to (max_fs,E,C_pad)
#   Linear weight (out,in)   -> (in,out), K/N padded to the packed layout.
# MXU-fed weights (embedding, conv, fc) are rounded through bf16 once so the
# kernel and the f32 reference consume identical parameter values.
# ----------------------------------------------------------------------------
def init_params(key, vocab_size, embedding_dim, num_filter, filter_sizes,
                output_dim, pad_idx=0):
    filter_sizes = tuple(filter_sizes)
    n_fs = len(filter_sizes)
    max_fs = max(filter_sizes)
    keys = iter(jax.random.split(key, 1 + 2 * n_fs + 4))

    def bf16_round(a):
        return a.astype(jnp.bfloat16).astype(jnp.float32)

    emb = jax.random.normal(next(keys), (vocab_size, embedding_dim),
                            jnp.float32)
    emb = emb.at[pad_idx].set(0.0)          # padding_idx row is zero

    conv_w_raw, conv_b_raw = [], []
    for fs in filter_sizes:
        bound = float(fs * embedding_dim) ** -0.5
        w = jax.random.uniform(next(keys), (fs, embedding_dim, num_filter),
                               jnp.float32, minval=-bound, maxval=bound)
        conv_w_raw.append(bf16_round(w))
        conv_b_raw.append(jax.random.uniform(
            next(keys), (1, num_filter), jnp.float32,
            minval=-bound, maxval=bound))

    in_fc = n_fs * num_filter
    bound = float(in_fc) ** -0.5
    fc_w = bf16_round(jax.random.uniform(next(keys), (in_fc, 64), jnp.float32,
                                         minval=-bound, maxval=bound))
    fc_b = jax.random.uniform(next(keys), (1, 64), jnp.float32,
                              minval=-bound, maxval=bound)
    bound = float(64) ** -0.5
    fc1_w = jax.random.uniform(next(keys), (64, output_dim), jnp.float32,
                               minval=-bound, maxval=bound)
    fc1_b = jax.random.uniform(next(keys), (1, output_dim), jnp.float32,
                               minval=-bound, maxval=bound)

    # ---- kernel-side packed, lane-dense layouts ----
    c_pad = _round_up(in_fc, 128)
    w_pack = np.zeros((max_fs, embedding_dim, c_pad), np.float32)
    b_pack = np.zeros((1, c_pad), np.float32)
    for f, (fs, w, b) in enumerate(zip(filter_sizes, conv_w_raw, conv_b_raw)):
        w_pack[:fs, :, f * num_filter:(f + 1) * num_filter] = np.asarray(w)
        b_pack[0, f * num_filter:(f + 1) * num_filter] = np.asarray(b)[0]

    fc_w_pack = np.zeros((c_pad, 64), np.float32)
    fc_w_pack[:in_fc, :] = np.asarray(fc_w)

    out_w = _round_up(64 + output_dim, 128)
    y_pad = out_w - 64
    fc1_w_pack = np.zeros((64, y_pad), np.float32)
    fc1_w_pack[:, :output_dim] = np.asarray(fc1_w)
    fc1_b_pack = np.zeros((1, y_pad), np.float32)
    fc1_b_pack[0, :output_dim] = np.asarray(fc1_b)[0]

    return {
        "embedding": emb.astype(jnp.bfloat16),
        # raw (reference) copies
        "conv_w_raw": conv_w_raw, "conv_b_raw": conv_b_raw,
        "fc_w_raw": fc_w, "fc_b_raw": fc_b,
        "fc1_w_raw": fc1_w, "fc1_b_raw": fc1_b,
        # packed (kernel) copies
        "conv_w_packed": jnp.asarray(w_pack, jnp.bfloat16),
        "conv_b_packed": jnp.asarray(b_pack, jnp.float32),
        "fc_w_packed": jnp.asarray(fc_w_pack, jnp.bfloat16),
        "fc_b_packed": fc_b,
        "fc1_w_packed": jnp.asarray(fc1_w_pack, jnp.float32),
        "fc1_b_packed": jnp.asarray(fc1_b_pack, jnp.float32),
        "filter_sizes": filter_sizes,
        "num_filter": num_filter,
        "output_dim": output_dim,
    }


if __name__ == "__main__":
    vocab_size, embedding_dim, num_filter = 50, 32, 8
    filter_sizes, output_dim = (3, 4, 5), 4
    B, T = 2, 16

    key = jax.random.PRNGKey(0)
    pkey, tkey = jax.random.split(key)
    params = init_params(pkey, vocab_size, embedding_dim, num_filter,
                         filter_sizes, output_dim, pad_idx=0)
    text = jax.random.randint(tkey, (B, T), 0, vocab_size, dtype=jnp.int32)

    fwd = jax.jit(functools.partial(textcnn_forward, params))
    x, y = jax.block_until_ready(fwd(text))

    assert x.shape == (B, 64), x.shape
    assert y.shape == (B, output_dim), y.shape
    assert x.dtype == jnp.float32 and y.dtype == jnp.float32

    x_ref, y_ref = textcnn_reference(params, text)
    # bf16 MXU operands in the kernel vs. f32 reference path -> loosened tol.
    assert jnp.allclose(x, x_ref, rtol=2e-2, atol=2e-2), "fc output mismatch"
    assert jnp.allclose(y, y_ref, rtol=2e-2, atol=2e-2), "fc1 output mismatch"

    print("KERNEL_OK")
</pallas_src>

<mosaic_0001>
module attributes {stable_mosaic.version = 11 : i64} {
  func.func @kernel(%arg0: i32, %arg1: memref<2x18x32xbf16, #tpu.memory_space<vmem>>, %arg2: memref<5x32x128xbf16, #tpu.memory_space<vmem>>, %arg3: memref<1x128xf32, #tpu.memory_space<vmem>>, %arg4: memref<14x128xf32, #tpu.memory_space<vmem>>, %arg5: memref<128x64xbf16, #tpu.memory_space<vmem>>, %arg6: memref<1x64xf32, #tpu.memory_space<vmem>>, %arg7: memref<64x64xf32, #tpu.memory_space<vmem>>, %arg8: memref<1x64xf32, #tpu.memory_space<vmem>>, %arg9: memref<2x128xf32, #tpu.memory_space<vmem>>) attributes {dimension_semantics = [#tpu.dimension_semantics<parallel>], iteration_bounds = array<i64: 1>, scalar_prefetch = 0 : i64, scratch_operands = 0 : i64, tpu.core_type = #tpu.core_type<tc>, window_params = [{transform_indices = @transform_0, window_bounds = array<i64: 2, 18, 32>}, {pipeline_mode = #tpu.pipeline_mode<synchronous>, transform_indices = @transform_1, window_bounds = array<i64: 5, 32, 128>}, {pipeline_mode = #tpu.pipeline_mode<synchronous>, transform_indices = @transform_2, window_bounds = array<i64: 1, 128>}, {pipeline_mode = #tpu.pipeline_mode<synchronous>, transform_indices = @transform_3, window_bounds = array<i64: 14, 128>}, {pipeline_mode = #tpu.pipeline_mode<synchronous>, transform_indices = @transform_4, window_bounds = array<i64: 128, 64>}, {pipeline_mode = #tpu.pipeline_mode<synchronous>, transform_indices = @transform_5, window_bounds = array<i64: 1, 64>}, {pipeline_mode = #tpu.pipeline_mode<synchronous>, transform_indices = @transform_6, window_bounds = array<i64: 64, 64>}, {pipeline_mode = #tpu.pipeline_mode<synchronous>, transform_indices = @transform_7, window_bounds = array<i64: 1, 64>}, {transform_indices = @transform_8, window_bounds = array<i64: 2, 128>}]} {
    %c0 = arith.constant 0 : index
    %c0_0 = arith.constant 0 : index
    %c0_1 = arith.constant 0 : index
    %0 = vector.load %arg1[%c0, %c0_0, %c0_1] : memref<2x18x32xbf16, #tpu.memory_space<vmem>>, vector<2x18x32xbf16>
    %1 = vector.shape_cast %0 : vector<2x18x32xbf16> to vector<36x32xbf16>
    %c0_2 = arith.constant 0 : index
    %c0_3 = arith.constant 0 : index
    %c0_4 = arith.constant 0 : index
    %2 = vector.load %arg2[%c0_2, %c0_3, %c0_4] : memref<5x32x128xbf16, #tpu.memory_space<vmem>>, vector<1x32x128xbf16>
    %3 = vector.shape_cast %2 : vector<1x32x128xbf16> to vector<32x128xbf16>
    %cst = arith.constant dense<0.000000e+00> : vector<36x128xf32>
    %4 = tpu.matmul %1, %3, %cst {dimension_numbers = #tpu.dot_dimension_numbers<[1], [0], [0], [1], [0, 0, 1, 1], [], []>} : vector<36x32xbf16>, vector<32x128xbf16>, vector<36x128xf32> -> vector<36x128xf32>
    %5 = vector.shape_cast %4 : vector<36x128xf32> to vector<2x18x128xf32>
    %6 = vector.extract_strided_slice %5 {offsets = [0, 0, 0], sizes = [2, 14, 128], strides = [1, 1, 1]} : vector<2x18x128xf32> to vector<2x14x128xf32>
    %c1 = arith.constant 1 : index
    %c0_5 = arith.constant 0 : index
    %c0_6 = arith.constant 0 : index
    %7 = vector.load %arg2[%c1, %c0_5, %c0_6] : memref<5x32x128xbf16, #tpu.memory_space<vmem>>, vector<1x32x128xbf16>
    %8 = vector.shape_cast %7 : vector<1x32x128xbf16> to vector<32x128xbf16>
    %cst_7 = arith.constant dense<0.000000e+00> : vector<36x128xf32>
    %9 = tpu.matmul %1, %8, %cst_7 {dimension_numbers = #tpu.dot_dimension_numbers<[1], [0], [0], [1], [0, 0, 1, 1], [], []>} : vector<36x32xbf16>, vector<32x128xbf16>, vector<36x128xf32> -> vector<36x128xf32>
    %10 = vector.shape_cast %9 : vector<36x128xf32> to vector<2x18x128xf32>
    %11 = vector.extract_strided_slice %10 {offsets = [0, 1, 0], sizes = [2, 14, 128], strides = [1, 1, 1]} : vector<2x18x128xf32> to vector<2x14x128xf32>
    %12 = arith.addf %6, %11 : vector<2x14x128xf32>
    %c2 = arith.constant 2 : index
    %c0_8 = arith.constant 0 : index
    %c0_9 = arith.constant 0 : index
    %13 = vector.load %arg2[%c2, %c0_8, %c0_9] : memref<5x32x128xbf16, #tpu.memory_space<vmem>>, vector<1x32x128xbf16>
    %14 = vector.shape_cast %13 : vector<1x32x128xbf16> to vector<32x128xbf16>
    %cst_10 = arith.constant dense<0.000000e+00> : vector<36x128xf32>
    %15 = tpu.matmul %1, %14, %cst_10 {dimension_numbers = #tpu.dot_dimension_numbers<[1], [0], [0], [1], [0, 0, 1, 1], [], []>} : vector<36x32xbf16>, vector<32x128xbf16>, vector<36x128xf32> -> vector<36x128xf32>
    %16 = vector.shape_cast %15 : vector<36x128xf32> to vector<2x18x128xf32>
    %17 = vector.extract_strided_slice %16 {offsets = [0, 2, 0], sizes = [2, 14, 128], strides = [1, 1, 1]} : vector<2x18x128xf32> to vector<2x14x128xf32>
    %18 = arith.addf %12, %17 : vector<2x14x128xf32>
    %c3 = arith.constant 3 : index
    %c0_11 = arith.constant 0 : index
    %c0_12 = arith.constant 0 : index
    %19 = vector.load %arg2[%c3, %c0_11, %c0_12] : memref<5x32x128xbf16, #tpu.memory_space<vmem>>, vector<1x32x128xbf16>
    %20 = vector.shape_cast %19 : vector<1x32x128xbf16> to vector<32x128xbf16>
    %cst_13 = arith.constant dense<0.000000e+00> : vector<36x128xf32>
    %21 = tpu.matmul %1, %20, %cst_13 {dimension_numbers = #tpu.dot_dimension_numbers<[1], [0], [0], [1], [0, 0, 1, 1], [], []>} : vector<36x32xbf16>, vector<32x128xbf16>, vector<36x128xf32> -> vector<36x128xf32>
    %22 = vector.shape_cast %21 : vector<36x128xf32> to vector<2x18x128xf32>
    %23 = vector.extract_strided_slice %22 {offsets = [0, 3, 0], sizes = [2, 14, 128], strides = [1, 1, 1]} : vector<2x18x128xf32> to vector<2x14x128xf32>
    %24 = arith.addf %18, %23 : vector<2x14x128xf32>
    %c4 = arith.constant 4 : index
    %c0_14 = arith.constant 0 : index
    %c0_15 = arith.constant 0 : index
    %25 = vector.load %arg2[%c4, %c0_14, %c0_15] : memref<5x32x128xbf16, #tpu.memory_space<vmem>>, vector<1x32x128xbf16>
    %26 = vector.shape_cast %25 : vector<1x32x128xbf16> to vector<32x128xbf16>
    %cst_16 = arith.constant dense<0.000000e+00> : vector<36x128xf32>
    %27 = tpu.matmul %1, %26, %cst_16 {dimension_numbers = #tpu.dot_dimension_numbers<[1], [0], [0], [1], [0, 0, 1, 1], [], []>} : vector<36x32xbf16>, vector<32x128xbf16>, vector<36x128xf32> -> vector<36x128xf32>
    %28 = vector.shape_cast %27 : vector<36x128xf32> to vector<2x18x128xf32>
    %29 = vector.extract_strided_slice %28 {offsets = [0, 4, 0], sizes = [2, 14, 128], strides = [1, 1, 1]} : vector<2x18x128xf32> to vector<2x14x128xf32>
    %30 = arith.addf %24, %29 : vector<2x14x128xf32>
    %c0_17 = arith.constant 0 : index
    %c0_18 = arith.constant 0 : index
    %31 = vector.load %arg4[%c0_17, %c0_18] : memref<14x128xf32, #tpu.memory_space<vmem>>, vector<14x128xf32>
    %32 = vector.shape_cast %31 : vector<14x128xf32> to vector<1x14x128xf32>
    %33 = vector.broadcast %32 : vector<1x14x128xf32> to vector<2x14x128xf32>
    %34 = arith.addf %30, %33 : vector<2x14x128xf32>
    %cst_19 = arith.constant dense<0xFF800000> : vector<2x128xf32>
    %35 = vector.multi_reduction <maximumf>, %34, %cst_19 [1] : vector<2x14x128xf32> to vector<2x128xf32>
    %c0_20 = arith.constant 0 : index
    %c0_21 = arith.constant 0 : index
    %36 = vector.load %arg3[%c0_20, %c0_21] : memref<1x128xf32, #tpu.memory_space<vmem>>, vector<1x128xf32>
    %37 = vector.broadcast %36 : vector<1x128xf32> to vector<2x128xf32>
    %38 = arith.addf %35, %37 : vector<2x128xf32>
    %cst_22 = arith.constant 0.000000e+00 : f32
    %39 = vector.broadcast %cst_22 : f32 to vector<2x128xf32>
    %40 = arith.maximumf %38, %39 : vector<2x128xf32>
    %41 = arith.truncf %40 : vector<2x128xf32> to vector<2x128xbf16>
    %c0_23 = arith.constant 0 : index
    %c0_24 = arith.constant 0 : index
    %42 = vector.load %arg5[%c0_23, %c0_24] : memref<128x64xbf16, #tpu.memory_space<vmem>>, vector<128x64xbf16>
    %cst_25 = arith.constant dense<0.000000e+00> : vector<2x64xf32>
    %43 = tpu.matmul %41, %42, %cst_25 {dimension_numbers = #tpu.dot_dimension_numbers<[1], [0], [0], [1], [0, 0, 1, 1], [], []>} : vector<2x128xbf16>, vector<128x64xbf16>, vector<2x64xf32> -> vector<2x64xf32>
    %c0_26 = arith.constant 0 : index
    %c0_27 = arith.constant 0 : index
    %44 = vector.load %arg6[%c0_26, %c0_27] : memref<1x64xf32, #tpu.memory_space<vmem>>, vector<1x64xf32>
    %45 = vector.broadcast %44 : vector<1x64xf32> to vector<2x64xf32>
    %46 = arith.addf %43, %45 : vector<2x64xf32>
    %c0_28 = arith.constant 0 : index
    %c0_29 = arith.constant 0 : index
    %47 = vector.load %arg7[%c0_28, %c0_29] : memref<64x64xf32, #tpu.memory_space<vmem>>, vector<64x64xf32>
    %cst_30 = arith.constant dense<0.000000e+00> : vector<2x64xf32>
    %48 = tpu.matmul %46, %47, %cst_30 {dimension_numbers = #tpu.dot_dimension_numbers<[1], [0], [0], [1], [0, 0, 1, 1], [], []>} : vector<2x64xf32>, vector<64x64xf32>, vector<2x64xf32> -> vector<2x64xf32>
    %c0_31 = arith.constant 0 : index
    %c0_32 = arith.constant 0 : index
    %49 = vector.load %arg8[%c0_31, %c0_32] : memref<1x64xf32, #tpu.memory_space<vmem>>, vector<1x64xf32>
    %50 = vector.broadcast %49 : vector<1x64xf32> to vector<2x64xf32>
    %51 = arith.addf %48, %50 : vector<2x64xf32>
    %52 = tpu.concatenate %46, %51 in 1 : vector<2x64xf32>, vector<2x64xf32> -> vector<2x128xf32>
    %c0_33 = arith.constant 0 : index
    %c0_34 = arith.constant 0 : index
    %53 = vector.load %arg9[%c0_33, %c0_34] : memref<2x128xf32, #tpu.memory_space<vmem>>, vector<2x128xf32>
    tpu.vector_store %arg9[%c0_33, %c0_34], %52 {strides = array<i32>} : memref<2x128xf32, #tpu.memory_space<vmem>>, vector<2x128xf32>,
    return
  }
  func.func @transform_0(%arg0: i32) -> (i32, i32, i32) {
    %c0_i32 = arith.constant 0 : i32
    %c0_i32_0 = arith.constant 0 : i32
    %c0_i32_1 = arith.constant 0 : i32
    return %arg0, %c0_i32, %c0_i32_0 : i32, i32, i32
  }
  func.func @transform_1(%arg0: i32) -> (i32, i32, i32) {
    %c0_i32 = arith.constant 0 : i32
    %c0_i32_0 = arith.constant 0 : i32
    %c0_i32_1 = arith.constant 0 : i32
    %c0_i32_2 = arith.constant 0 : i32
    return %c0_i32, %c0_i32_0, %c0_i32_1 : i32, i32, i32
  }
  func.func @transform_2(%arg0: i32) -> (i32, i32) {
    %c0_i32 = arith.constant 0 : i32
    %c0_i32_0 = arith.constant 0 : i32
    %c0_i32_1 = arith.constant 0 : i32
    return %c0_i32, %c0_i32_0 : i32, i32
  }
  func.func @transform_3(%arg0: i32) -> (i32, i32) {
    %c0_i32 = arith.constant 0 : i32
    %c0_i32_0 = arith.constant 0 : i32
    %c0_i32_1 = arith.constant 0 : i32
    return %c0_i32, %c0_i32_0 : i32, i32
  }
  func.func @transform_4(%arg0: i32) -> (i32, i32) {
    %c0_i32 = arith.constant 0 : i32
    %c0_i32_0 = arith.constant 0 : i32
    %c0_i32_1 = arith.constant 0 : i32
    return %c0_i32, %c0_i32_0 : i32, i32
  }
  func.func @transform_5(%arg0: i32) -> (i32, i32) {
    %c0_i32 = arith.constant 0 : i32
    %c0_i32_0 = arith.constant 0 : i32
    %c0_i32_1 = arith.constant 0 : i32
    return %c0_i32, %c0_i32_0 : i32, i32
  }
  func.func @transform_6(%arg0: i32) -> (i32, i32) {
    %c0_i32 = arith.constant 0 : i32
    %c0_i32_0 = arith.constant 0 : i32
    %c0_i32_1 = arith.constant 0 : i32
    return %c0_i32, %c0_i32_0 : i32, i32
  }
  func.func @transform_7(%arg0: i32) -> (i32, i32) {
    %c0_i32 = arith.constant 0 : i32
    %c0_i32_0 = arith.constant 0 : i32
    %c0_i32_1 = arith.constant 0 : i32
    return %c0_i32, %c0_i32_0 : i32, i32
  }
  func.func @transform_8(%arg0: i32) -> (i32, i32) {
    %c0_i32 = arith.constant 0 : i32
    %c0_i32_0 = arith.constant 0 : i32
    return %arg0, %c0_i32 : i32, i32
  }
}

</mosaic_0001>

<bundles_post_ra>
// kernel: textcnn_forward.1
= control target key start
LH: loop header
LB: loop body
LE: loop exit
PB: predicated region body
PF: predicated region fallthrough
CT: control target
= control target key end

     0   :  { %vm48_vm0 = vcmask 1040384   ;;  %vm52_vm1 = vcmask 1041409   ;;  %vm56_vm2 = vcmask 1042434   ;;  %vm60_vm3 = vcmask 1043459   ;;  %s1146_s26 = smov 64   ;;  %s1657_s1 = inlined_call_operand.vmem [shape: bf16[5,32,128], index: 1, kind: input, shape index: {}]   ;;  %s1658_s0 = inlined_call_operand.vmem [shape: bf16[2,18,32], index: 0, kind: input, shape index: {}]   ;;  %s1659_s2 = inlined_call_operand.vmem [shape: f32[1,128], index: 2, kind: input, shape index: {}]   ;;  %s1660_s5 = inlined_call_operand.vmem [shape: f32[1,64], index: 5, kind: input, shape index: {}]   ;;  %s1661_s3 = inlined_call_operand.vmem [shape: f32[14,128], index: 3, kind: input, shape index: {}]   ;;  %s1662_s4 = inlined_call_operand.vmem [shape: bf16[128,64], index: 4, kind: input, shape index: {}]   ;;  %s1663_s6 = inlined_call_operand.vmem [shape: f32[64,64], index: 6, kind: input, shape index: {}]   ;;  %s1664_s7 = inlined_call_operand.vmem [shape: f32[1,64], index: 7, kind: input, shape index: {}]   ;;  %s1665_s8 = inlined_call_operand.vmem [shape: f32[2,128], index: 8, kind: output, shape index: {}]  }
   0x1   :  { %v1121_v0 = vld [vmem:[%s1657_s1 + $0x8] sm:$0xff]  ;;  %v30_v1 = vld [vmem:[%s1658_s0] sm:$0xf]  ;;  %v31_v2 = vld [vmem:[%s1658_s0 + $0x4] sm:$0xf]  ;;  %vm162_vm4 = vcmask 261120  }
   0x2   :  { %1138 = vmatpush.bf16.msra.mxu2 %v1121_v0  ;;  %v1120_v3 = vld [vmem:[%s1657_s1] sm:$0xff]  ;;  %v42_v4 = vrot.slane %v30_v1, 3  ;;  %v43_v5 = vrot.slane %v31_v2, 3  ;;  %1139 = vmatpush.bf16.msra.mxu3 %v1121_v0  ;;  %v1123_v10 = vld [vmem:[%s1657_s1 + $0x18] sm:$0xff]  ;;  %v1125_v11 = vld [vmem:[%s1657_s1 + $0x28] sm:$0xff]  ;;  %vm309_vm6 = vcmask 1044484  }
   0x3   :  { %175 = vmatpush.bf16.msra.mxu0 %v1121_v0  ;;  %274 = vmatpush.bf16.msra.mxu1 %v1123_v10  ;;  %v1122_v20 = vld [vmem:[%s1657_s1 + $0x10] sm:$0xff]  ;;  %v33_v22 = vld [vmem:[%s1658_s0 + $0xc] sm:$0xf]  ;;  %v32_v24 = vld [vmem:[%s1658_s0 + $0x8] sm:$0x1]  ;;  %vm311_vm7 = vcmask 1046534  }
   0x4   :  { %v1205_v6 = vsel %vm48_vm0, %v30_v1, %v42_v4  ;;  %v53_v7 = vsel %vm52_vm1, %v30_v1, %v42_v4  ;;  %v57_v8 = vsel %vm56_vm2, %v30_v1, %v42_v4  ;;  %v61_v9 = vsel %vm60_vm3, %v30_v1, %v42_v4  ;;  %v34_v26 = vld [vmem:[%s1658_s0 + $0x10] sm:$0xf]  ;;  %v35_v43 = vld [vmem:[%s1658_s0 + $0x14] sm:$0x1]  ;;  %v1124_v49 = vld [vmem:[%s1657_s1 + $0x20] sm:$0xff] }
   0x5   :  { %v1216_v12 = vrot.slane %v53_v7, 1  ;;  %v1218_v13 = vrot.slane %v57_v8, 2  ;;  %v1220_v14 = vrot.slane %v61_v9, 3  ;;  %110 = vst [vmem:[#allocation1] ss:$9 sm:$0xff] %v1205_v6  ;;  %v67_v15 = vsel %vm52_vm1, %v31_v2, %v43_v5  ;;  %v1127_v54 = vld [vmem:[%s1657_s1 + $0x38] sm:$0xff]  ;;  %vm308_vm5 = vmor %vm48_vm0, %vm56_vm2 }
   0x6   :  { %1140 = vmatpush.bf16.msra.mxu2 %v1120_v3  ;;  %v70_v16 = vsel %vm56_vm2, %v31_v2, %v43_v5  ;;  %v73_v17 = vsel %vm60_vm3, %v31_v2, %v43_v5  ;;  %v1227_v18 = vsel %vm48_vm0, %v31_v2, %v43_v5  ;;  %v1229_v19 = vrot.slane %v67_v15, 1  ;;  %1141 = vmatpush.bf16.msra.mxu3 %v1120_v3  ;;  %v1126_v55 = vld [vmem:[%s1657_s1 + $0x30] sm:$0xff]  ;;  %v1129_v58 = vld [vmem:[%s1657_s1 + $0x48] sm:$0xff]  ;;  %v1128_v60 = vld [vmem:[%s1657_s1 + $0x40] sm:$0xff] }
   0x7   :  { %113 = vst [vmem:[#allocation1 + $0x1] ss:$9 sm:$0xff] %v1216_v12  ;;  %v1235_v21 = vrot.slane %v70_v16, 2  ;;  %v1241_v23 = vrot.slane %v73_v17, 3  ;;  %176 = vmatpush.bf16.msra.mxu0 %v1120_v3  ;;  %275 = vmatpush.bf16.msra.mxu1 %v1122_v20  ;;  %v45_v25 = vrot.slane %v33_v22, 3  ;;  %v44_v27 = vrot.slane %v32_v24, 3  ;;  %vm310_vm8 = vmor %vm308_vm5, %vm309_vm6 }
   0x8   :  { %116 = vst [vmem:[#allocation1 + $0x2] ss:$9 sm:$0xff] %v1218_v13  ;;  %v46_v28 = vrot.slane %v34_v26, 3  ;;  %v47_v45 = vrot.slane %v35_v43, 3  ;;  %vm1408_vm9 = vmor %vm310_vm8, %vm311_vm7  ;;  %vm845_vm10 = vcmask 1045504   ;;  %vm973_vm11 = vcmask 523264  }
   0x9   :  { %119 = vst [vmem:[#allocation1 + $0x3] ss:$9 sm:$0xff] %v1220_v14  ;;  %v82_v29 = vsel %vm52_vm1, %v33_v22, %v45_v25  ;;  %v85_v30 = vsel %vm56_vm2, %v33_v22, %v45_v25  ;;  %v1257_v31 = vsel %vm48_vm0, %v32_v24, %v44_v27  ;;  %v88_v32 = vsel %vm60_vm3, %v33_v22, %v45_v25 }
   0xa   :  { %442 = vmatpush.bf16.msrb.mxu2 %v1125_v11  ;;  %121 = vst [vmem:[#allocation1 + $0x4] ss:$9 sm:$0xff] %v1227_v18  ;;  %v1261_v33 = vsel %vm48_vm0, %v33_v22, %v45_v25  ;;  %v1263_v34 = vrot.slane %v82_v29, 1  ;;  %v1265_v35 = vrot.slane %v85_v30, 2  ;;  %v94_v36 = vsel %vm52_vm1, %v34_v26, %v46_v28  ;;  %556 = vmatpush.bf16.msrb.mxu3 %v1127_v54 }
   0xb   :  { %124 = vst [vmem:[#allocation1 + $0x5] ss:$9 sm:$0xff] %v1229_v19  ;;  %v1268_v38 = vrot.slane %v88_v32, 3  ;;  %v97_v39 = vsel %vm56_vm2, %v34_v26, %v46_v28  ;;  %v1275_v40 = vsel %vm48_vm0, %v34_v26, %v46_v28  ;;  %v1277_v41 = vrot.slane %v94_v36, 1  ;;  %719 = vmatpush.bf16.msrb.mxu0 %v1129_v58 }
   0xc   :  { %127 = vst [vmem:[#allocation1 + $0x6] ss:$9 sm:$0xff] %v1235_v21  ;;  %v1280_v42 = vrot.slane %v97_v39, 2  ;;  %v100_v44 = vsel %vm60_vm3, %v34_v26, %v46_v28  ;;  %v1294_v47 = vsel %vm48_vm0, %v35_v43, %v47_v45 }
   0xd   :  { %130 = vst [vmem:[#allocation1 + $0x7] ss:$9 sm:$0xff] %v1241_v23  ;;  %v1291_v46 = vrot.slane %v100_v44, 3 }
   0xe   :  { %443 = vmatpush.bf16.msrb.mxu2 %v1124_v49  ;;  %557 = vmatpush.bf16.msrb.mxu3 %v1126_v55 }
   0xf   :  { %720 = vmatpush.bf16.msrb.mxu0 %v1128_v60 }
  0x14   :  { %v131_v37 = vld [vmem:[#allocation1] sm:$0xff] }
  0x15   :  { %132 = vst [vmem:[#allocation1] ss:$9 sm:$0xff] %v1257_v31  ;;  %1015 = vmatmul.msk.bf16.vlgmr.msra.gmra.mxu0 %vm162_vm4, %v131_v37 }
  0x16   :  { %133 = vst [vmem:[#allocation1 + $0x1] ss:$9 sm:$0xff] %v1261_v33 }
  0x17   :  { %135 = vst [vmem:[#allocation1 + $0x2] ss:$9 sm:$0xff] %v1263_v34 }
  0x18   :  { %137 = vst [vmem:[#allocation1 + $0x3] ss:$9 sm:$0xff] %v1265_v35 }
  0x19   :  { %139 = vst [vmem:[#allocation1 + $0x4] ss:$9 sm:$0xff] %v1268_v38 }
  0x1a   :  { %140 = vst [vmem:[#allocation1 + $0x5] ss:$9 sm:$0xff] %v1275_v40 }
  0x1b   :  { %142 = vst [vmem:[#allocation1 + $0x6] ss:$9 sm:$0xff] %v1277_v41 }
  0x1c   :  { %144 = vst [vmem:[#allocation1 + $0x7] ss:$9 sm:$0xff] %v1280_v42 }
  0x23   :  { %v145_v48 = vld [vmem:[#allocation1] sm:$0xff] }
  0x24   :  { %1016 = vmatmul.msk.bf16.vlgmr.msra.gmra.mxu2 %vm162_vm4, %v145_v48  ;;  %147 = vst [vmem:[#allocation1] ss:$9 sm:$0xff] %v1291_v46 }
  0x25   :  { %148 = vst [vmem:[#allocation1 + $0x1] ss:$9 sm:$0xff] %v1294_v47 }
  0x2c   :  { %v149_v50 = vld [vmem:[#allocation1] sm:$0xff] }
  0x2d   :  { %222 = vst [vmem:[#allocation1] ss:$9 sm:$0xff] %v1205_v6  ;;  %1017 = vmatmul.msk.bf16.vlgmr.msra.gmra.mxu3 %vm162_vm4, %v149_v50 }
  0x2e   :  { %224 = vst [vmem:[#allocation1 + $0x1] ss:$9 sm:$0xff] %v1216_v12 }
  0x2f   :  { %226 = vst [vmem:[#allocation1 + $0x2] ss:$9 sm:$0xff] %v1218_v13 }
  0x30   :  { %228 = vst [vmem:[#allocation1 + $0x3] ss:$9 sm:$0xff] %v1220_v14 }
  0x31   :  { %230 = vst [vmem:[#allocation1 + $0x4] ss:$9 sm:$0xff] %v1227_v18 }
  0x32   :  { %232 = vst [vmem:[#allocation1 + $0x5] ss:$9 sm:$0xff] %v1229_v19 }
  0x33   :  { %234 = vst [vmem:[#allocation1 + $0x6] ss:$9 sm:$0xff] %v1235_v21 }
  0x34   :  { %236 = vst [vmem:[#allocation1 + $0x7] ss:$9 sm:$0xff] %v1241_v23 }
  0x3b   :  { %v237_v51 = vld [vmem:[#allocation1] sm:$0xff] }
  0x3c   :  { %1030 = vmatmul.msk.bf16.vlgmr.msra.gmra.mxu1 %vm162_vm4, %v237_v51  ;;  %238 = vst [vmem:[#allocation1] ss:$9 sm:$0xff] %v1257_v31 }
  0x3d   :  { %239 = vst [vmem:[#allocation1 + $0x1] ss:$9 sm:$0xff] %v1261_v33 }
  0x3e   :  { %240 = vst [vmem:[#allocation1 + $0x2] ss:$9 sm:$0xff] %v1263_v34 }
  0x3f   :  { %241 = vst [vmem:[#allocation1 + $0x3] ss:$9 sm:$0xff] %v1265_v35 }
  0x40   :  { %242 = vst [vmem:[#allocation1 + $0x4] ss:$9 sm:$0xff] %v1268_v38 }
  0x41   :  { %243 = vst [vmem:[#allocation1 + $0x5] ss:$9 sm:$0xff] %v1275_v40 }
  0x42   :  { %244 = vst [vmem:[#allocation1 + $0x6] ss:$9 sm:$0xff] %v1277_v41 }
  0x43   :  { %245 = vst [vmem:[#allocation1 + $0x7] ss:$9 sm:$0xff] %v1280_v42 }
  0x4a   :  { %v246_v52 = vld [vmem:[#allocation1] sm:$0xff] }
  0x4b   :  { %247 = vst [vmem:[#allocation1] ss:$9 sm:$0xff] %v1291_v46 }
  0x4c   :  { %248 = vst [vmem:[#allocation1 + $0x1] ss:$9 sm:$0xff] %v1294_v47  ;;  %1031 = vmatmul.msk.bf16.gmra.mxu1 %vm162_vm4, %v246_v52 }
  0x53   :  { %v249_v53 = vld [vmem:[#allocation1] sm:$0xff] }
  0x54   :  { %390 = vst [vmem:[#allocation1] ss:$9 sm:$0xff] %v1205_v6 }
  0x55   :  { %392 = vst [vmem:[#allocation1 + $0x1] ss:$9 sm:$0xff] %v1216_v12 }
  0x56   :  { %394 = vst [vmem:[#allocation1 + $0x2] ss:$9 sm:$0xff] %v1218_v13 }
  0x57   :  { %396 = vst [vmem:[#allocation1 + $0x3] ss:$9 sm:$0xff] %v1220_v14 }
  0x58   :  { %398 = vst [vmem:[#allocation1 + $0x4] ss:$9 sm:$0xff] %v1227_v18 }
  0x59   :  { %400 = vst [vmem:[#allocation1 + $0x5] ss:$9 sm:$0xff] %v1229_v19 }
  0x5a   :  { %402 = vst [vmem:[#allocation1 + $0x6] ss:$9 sm:$0xff] %v1235_v21 }
  0x5b   :  { %404 = vst [vmem:[#allocation1 + $0x7] ss:$9 sm:$0xff] %v1241_v23 }
  0x5c   :  { %1032 = vmatmul.msk.bf16.gmra.mxu1 %vm162_vm4, %v249_v53 }
  0x62   :  { %v405_v56 = vld [vmem:[#allocation1] sm:$0xff] }
  0x63   :  { %1049 = vmatmul.msk.bf16.vlgmr.msrb.gmra.mxu2 %vm162_vm4, %v405_v56  ;;  %406 = vst [vmem:[#allocation1] ss:$9 sm:$0xff] %v1257_v31 }
  0x64   :  { %407 = vst [vmem:[#allocation1 + $0x1] ss:$9 sm:$0xff] %v1261_v33 }
  0x65   :  { %408 = vst [vmem:[#allocation1 + $0x2] ss:$9 sm:$0xff] %v1263_v34 }
  0x66   :  { %409 = vst [vmem:[#allocation1 + $0x3] ss:$9 sm:$0xff] %v1265_v35 }
  0x67   :  { %410 = vst [vmem:[#allocation1 + $0x4] ss:$9 sm:$0xff] %v1268_v38 }
  0x68   :  { %411 = vst [vmem:[#allocation1 + $0x5] ss:$9 sm:$0xff] %v1275_v40 }
  0x69   :  { %412 = vst [vmem:[#allocation1 + $0x6] ss:$9 sm:$0xff] %v1277_v41 }
  0x6a   :  { %413 = vst [vmem:[#allocation1 + $0x7] ss:$9 sm:$0xff] %v1280_v42 }
  0x71   :  { %v414_v57 = vld [vmem:[#allocation1] sm:$0xff] }
  0x72   :  { %415 = vst [vmem:[#allocation1] ss:$9 sm:$0xff] %v1291_v46 }
  0x73   :  { %1050 = vmatmul.msk.bf16.gmra.mxu2 %vm162_vm4, %v414_v57  ;;  %416 = vst [vmem:[#allocation1 + $0x1] ss:$9 sm:$0xff] %v1294_v47 }
  0x7a   :  { %v417_v59 = vld [vmem:[#allocation1] sm:$0xff] }
  0x7b   :  { %504 = vst [vmem:[#allocation1] ss:$9 sm:$0xff] %v1205_v6 }
  0x7c   :  { %506 = vst [vmem:[#allocation1 + $0x1] ss:$9 sm:$0xff] %v1216_v12 }
  0x7d   :  { %508 = vst [vmem:[#allocation1 + $0x2] ss:$9 sm:$0xff] %v1218_v13 }
  0x7e   :  { %510 = vst [vmem:[#allocation1 + $0x3] ss:$9 sm:$0xff] %v1220_v14 }
  0x7f   :  { %512 = vst [vmem:[#allocation1 + $0x4] ss:$9 sm:$0xff] %v1227_v18 }
  0x80   :  { %514 = vst [vmem:[#allocation1 + $0x5] ss:$9 sm:$0xff] %v1229_v19 }
  0x81   :  { %516 = vst [vmem:[#allocation1 + $0x6] ss:$9 sm:$0xff] %v1235_v21 }
  0x82   :  { %518 = vst [vmem:[#allocation1 + $0x7] ss:$9 sm:$0xff] %v1241_v23 }
  0x83   :  { %1051 = vmatmul.msk.bf16.gmra.mxu2 %vm162_vm4, %v417_v59 }
  0x89   :  { %v519_v61 = vld [vmem:[#allocation1] sm:$0xff] }
  0x8a   :  { %1064 = vmatmul.msk.bf16.vlgmr.msrb.gmra.mxu3 %vm162_vm4, %v519_v61  ;;  %520 = vst [vmem:[#allocation1] ss:$9 sm:$0xff] %v1257_v31 }
  0x8b   :  { %521 = vst [vmem:[#allocation1 + $0x1] ss:$9 sm:$0xff] %v1261_v33 }
  0x8c   :  { %522 = vst [vmem:[#allocation1 + $0x2] ss:$9 sm:$0xff] %v1263_v34 }
  0x8d   :  { %523 = vst [vmem:[#allocation1 + $0x3] ss:$9 sm:$0xff] %v1265_v35 }
  0x8e   :  { %524 = vst [vmem:[#allocation1 + $0x4] ss:$9 sm:$0xff] %v1268_v38 }
  0x8f   :  { %525 = vst [vmem:[#allocation1 + $0x5] ss:$9 sm:$0xff] %v1275_v40 }
  0x90   :  { %526 = vst [vmem:[#allocation1 + $0x6] ss:$9 sm:$0xff] %v1277_v41 }
  0x91   :  { %527 = vst [vmem:[#allocation1 + $0x7] ss:$9 sm:$0xff] %v1280_v42 }
  0x92   :  { %v178_v49 = vpop.f32.mrf.mxu0 }
  0x93   :  { %v197_v50 = vrot.slane %v178_v49, 6 }
  0x98   :  { %v528_v62 = vld [vmem:[#allocation1] sm:$0xff] }
  0x99   :  { %529 = vst [vmem:[#allocation1] ss:$9 sm:$0xff] %v1291_v46 }
  0x9a   :  { %1065 = vmatmul.msk.bf16.gmra.mxu3 %vm162_vm4, %v528_v62  ;;  %530 = vst [vmem:[#allocation1 + $0x1] ss:$9 sm:$0xff] %v1294_v47 }
  0xa1   :  { %v531_v63 = vld [vmem:[#allocation1] sm:$0xff] }
  0xa2   :  { %667 = vst [vmem:[#allocation1] ss:$9 sm:$0xff] %v1205_v6 }
  0xa3   :  { %669 = vst [vmem:[#allocation1 + $0x1] ss:$9 sm:$0xff] %v1216_v12 }
  0xa4   :  { %671 = vst [vmem:[#allocation1 + $0x2] ss:$9 sm:$0xff] %v1218_v13 }
  0xa5   :  { %673 = vst [vmem:[#allocation1 + $0x3] ss:$9 sm:$0xff] %v1220_v14 }
  0xa6   :  { %675 = vst [vmem:[#allocation1 + $0x4] ss:$9 sm:$0xff] %v1227_v18 }
  0xa7   :  { %677 = vst [vmem:[#allocation1 + $0x5] ss:$9 sm:$0xff] %v1229_v19  ;;  %v183_v12 = vpop.f32.mrf.mxu2 }
  0xa8   :  { %679 = vst [vmem:[#allocation1 + $0x6] ss:$9 sm:$0xff] %v1235_v21  ;;  %v200_v15 = vrot.slane %v183_v12, 2  ;;  %v201_v16 = vrot.slane %v183_v12, 4 }
  0xa9   :  { %681 = vst [vmem:[#allocation1 + $0x7] ss:$9 sm:$0xff] %v1241_v23 }
  0xaa   :  { %1066 = vmatmul.msk.bf16.gmra.mxu3 %vm162_vm4, %v531_v63 }
  0xb0   :  { %v682_v0 = vld [vmem:[#allocation1] sm:$0xff]  ;;  %v188_v1 = vpop.f32.mrf.mxu3 }
  0xb1   :  { %1084 = vmatmul.msk.bf16.vlgmr.msrb.gmra.mxu0 %vm162_vm4, %v682_v0  ;;  %683 = vst [vmem:[#allocation1] ss:$9 sm:$0xff] %v1257_v31 }
  0xb2   :  { %684 = vst [vmem:[#allocation1 + $0x1] ss:$9 sm:$0xff] %v1261_v33 }
  0xb3   :  { %685 = vst [vmem:[#allocation1 + $0x2] ss:$9 sm:$0xff] %v1263_v34  ;;  %v202_v34 = vrot.slane %v183_v12, 6 }
  0xb4   :  { %686 = vst [vmem:[#allocation1 + $0x3] ss:$9 sm:$0xff] %v1265_v35  ;;  %v1418_v35 = vpop.f32.mrf.mxu2 }
  0xb5   :  { %687 = vst [vmem:[#allocation1 + $0x4] ss:$9 sm:$0xff] %v1268_v38  ;;  %v203_v36 = vrot.slane %v1418_v35, 2 }
  0xb6   :  { %688 = vst [vmem:[#allocation1 + $0x5] ss:$9 sm:$0xff] %v1275_v40 }
  0xb7   :  { %689 = vst [vmem:[#allocation1 + $0x6] ss:$9 sm:$0xff] %v1277_v41 }
  0xb8   :  { %690 = vst [vmem:[#allocation1 + $0x7] ss:$9 sm:$0xff] %v1280_v42  ;;  %v189_v2 = vpop.f32.mrf.mxu3 }
  0xb9   :  { %v1395_v3 = vpop.f32.mrf.mxu1 }
  0xba   :  { %v298_v9 = vrot.slane %v1395_v3, 6  ;;  %v296_v55 = vrot.slane %v1395_v3, 2  ;;  %v297_v56 = vrot.slane %v1395_v3, 4 }
  0xbc   :  { %v1406_v17 = vrot.slane %v298_v9, 7  ;;  %v315_v63 = vrot.slane %v296_v55, 7  ;;  %v318_v2 = vrot.slane %v297_v56, 7 }
  0xbe   :  { %v323_v26 = vrot.slane %v1406_v17, 2 }
  0xbf   :  { %v691_v4 = vld [vmem:[#allocation1] sm:$0xff] }
  0xc0   :  { %692 = vst [vmem:[#allocation1] ss:$9 sm:$0xff] %v1291_v46 }
  0xc1   :  { %1085 = vmatmul.msk.bf16.gmra.mxu0 %vm162_vm4, %v691_v4  ;;  %693 = vst [vmem:[#allocation1 + $0x1] ss:$9 sm:$0xff] %v1294_v47  ;;  %v1400_v5 = vpop.f32.mrf.mxu1  ;;  %v180_v4 = vpop.f32.mrf.mxu0 }
  0xc2   :  { %v324_v30 = vrot.slane %v1400_v5, 7  ;;  %v299_v47 = vrot.slane %v1400_v5, 2  ;;  %v300_v54 = vrot.slane %v1400_v5, 4 }
  0xc4   :  { %v325_v38 = vsel %vm1408_vm9, %v323_v26, %v324_v30  ;;  %v327_v51 = vrot.slane %v299_v47, 7  ;;  %v326_v57 = vrot.slane %v324_v30, 2  ;;  %v330_v62 = vrot.slane %v300_v54, 7 }
  0xc5   :  { %v374_v53 = vadd.f32 %v325_v38, %v197_v50 }
  0xc6   :  { %v329_v58 = vrot.slane %v327_v51, 2  ;;  %v332_v26 = vrot.slane %v330_v62, 2 }
  0xc8   :  { %v694_v11 = vld [vmem:[#allocation1] sm:$0xff] }
  0xc9   :  { %v282_v6 = vpop.f32.mrf.mxu1 }
  0xca   :  { %v303_v7 = vrot.slane %v282_v6, 4  ;;  %v304_v10 = vrot.slane %v282_v6, 6  ;;  %v1036_v13 = vrot.slane %v282_v6, 11  ;;  %v328_v6 = vsel %vm1408_vm9, %v326_v57, %v327_v51 }
  0xcc   :  { %v337_v8 = vrot.slane %v303_v7, 7  ;;  %v340_v18 = vrot.slane %v304_v10, 7  ;;  %v331_v7 = vsel %vm1408_vm9, %v329_v58, %v330_v62  ;;  %v198_v10 = vrot.slane %v180_v4, 2 }
  0xce   :  { %v339_v14 = vrot.slane %v337_v8, 2  ;;  %v338_v23 = vsel %vm1408_vm9, %v1036_v13, %v337_v8  ;;  %v342_v31 = vrot.slane %v340_v18, 2  ;;  %v205_v8 = vrot.slane %v1418_v35, 6 }
  0xcf   :  { %v378_v28 = vadd.f32 %v338_v23, %v200_v15  ;;  %v376_v13 = vadd.f32 %v331_v7, %v198_v10 }
  0xd0   :  { %v341_v24 = vsel %vm1408_vm9, %v339_v14, %v340_v18  ;;  %v317_v18 = vrot.slane %v315_v63, 2 }
  0xd1   :  { %1086 = vmatmul.msk.bf16.gmra.mxu0 %vm162_vm4, %v694_v11  ;;  %v284_v19 = vpop.f32.mrf.mxu1  ;;  %v379_v29 = vadd.f32 %v341_v24, %v201_v16  ;;  %v375_v11 = vadd.f32 %v328_v6, %v180_v4  ;;  %v1033_v16 = vrot.slane %v1395_v3, 9 }
  0xd2   :  { %v305_v20 = vrot.slane %v284_v19, 2  ;;  %v343_v22 = vrot.slane %v284_v19, 7  ;;  %v306_v27 = vrot.slane %v284_v19, 4  ;;  %v307_v52 = vrot.slane %v284_v19, 6 }
  0xd3   :  { %v316_v3 = vsel %vm1408_vm9, %v1033_v16, %v315_v63 }
  0xd4   :  { %v346_v25 = vrot.slane %v305_v20, 7  ;;  %v345_v32 = vrot.slane %v343_v22, 2  ;;  %v1421_v37 = vrot.slane %v306_v27, 7  ;;  %v344_v40 = vsel %vm1408_vm9, %v342_v31, %v343_v22 }
  0xd5   :  { %v1432_v43 = vadd.f32 %v344_v40, %v202_v34  ;;  %v352_v60 = vrot.slane %v307_v52, 7  ;;  %v320_v22 = vrot.slane %v318_v2, 2  ;;  %v1034_v27 = vrot.slane %v1400_v5, 13 }
  0xd6   :  { %v348_v33 = vrot.slane %v346_v25, 2  ;;  %v347_v41 = vsel %vm1408_vm9, %v345_v32, %v346_v25  ;;  %v195_v32 = vrot.slane %v178_v49, 2  ;;  %v319_v34 = vsel %vm1408_vm9, %v317_v18, %v318_v2  ;;  %v1508_v18 = vld [vmem:[%s1661_s3] sm:$0xff] }
  0xd7   :  { %v1435_v44 = vadd.f32 %v347_v41, %v1418_v35  ;;  %v354_v12 = vrot.slane %v352_v60, 2  ;;  %v351_v38 = vrot.slane %v1421_v37, 2  ;;  %v204_v5 = vrot.slane %v1418_v35, 4 }
  0xd8   :  { %v350_v42 = vsel %vm1408_vm9, %v348_v33, %v1421_v37  ;;  %v196_v33 = vrot.slane %v178_v49, 4  ;;  %v334_v40 = vsel %vm1408_vm9, %v332_v26, %v1034_v27 }
  0xd9   :  { %v287_v39 = vpop.f32.mrf.mxu1  ;;  %v1437_v45 = vadd.f32 %v350_v42, %v203_v36  ;;  %v322_v36 = vsel %vm1408_vm9, %v320_v22, %v1406_v17  ;;  %v372_v42 = vadd.f32 %v319_v34, %v195_v32 }
  0xda   :  { %v355_v1 = vrot.slane %v287_v39, 7  ;;  %v199_v39 = vrot.slane %v180_v4, 4 }
  0xdc   :  { %v356_v15 = vsel %vm1408_vm9, %v354_v12, %v355_v1 }
  0xdd   :  { %v384_v20 = vadd.f32 %v356_v15, %v205_v8 }
  0xe1   :  { %v289_v46 = vpop.f32.mrf.mxu1 }
  0xe2   :  { %v373_v46 = vadd.f32 %v322_v36, %v196_v33 }
  0xe6   :  { %v1440_v48 = vpop.f32.mrf.mxu2 }
  0xe7   :  { %v464_v41 = vrot.slane %v1440_v48, 4  ;;  %v465_v37 = vrot.slane %v1440_v48, 6 }
  0xe9   :  { %v486_v58 = vadd.f32 %v464_v41, %v372_v42 }
  0xee   :  { %v1445_v59 = vpop.f32.mrf.mxu2 }
  0xef   :  { %v1448_v61 = vadd.f32 %v1445_v59, %v374_v53  ;;  %v466_v0 = vrot.slane %v1445_v59, 2  ;;  %v467_v9 = vrot.slane %v1445_v59, 4  ;;  %v468_v35 = vrot.slane %v1445_v59, 6 }
  0xf0   :  { %v377_v53 = vadd.f32 %v334_v40, %v199_v39 }
  0xf1   :  { %v1457_v14 = vadd.f32 %v466_v0, %v375_v11  ;;  %v1462_v25 = vadd.f32 %v467_v9, %v376_v13 }
  0xf2   :  { %v1497_v63 = vadd.f32 %v468_v35, %v377_v53 }
  0xf6   :  { %v450_v19 = vpop.f32.mrf.mxu2 }
  0xf7   :  { %v469_v23 = vrot.slane %v450_v19, 4  ;;  %v470_v24 = vrot.slane %v450_v19, 6  ;;  %v1137_v19 = vld [vmem:[%s1662_s4 + $0x38] sm:$0xff] }
  0xf8   :  { %948 = vmatpush.bf16.msrb.mxu1 %v1137_v19 }
  0xf9   :  { %v1465_v30 = vadd.f32 %v469_v23, %v378_v28  ;;  %v1467_v31 = vadd.f32 %v470_v24, %v379_v29  ;;  %v463_v28 = vrot.slane %v1440_v48, 2  ;;  %v371_v29 = vadd.f32 %v316_v3, %v178_v49 }
  0xfa   :  { %v353_v49 = vsel %vm1408_vm9, %v351_v38, %v352_v60  ;;  %v779_v24 = vrot.slane %v1508_v18, 2 }
  0xfb   :  { %v485_v56 = vadd.f32 %v463_v28, %v371_v29  ;;  %v383_v57 = vadd.f32 %v353_v49, %v204_v5 }
  0xfe   :  { %v452_v47 = vpop.f32.mrf.mxu2 }
  0xff   :  { %v471_v50 = vrot.slane %v452_v47, 2  ;;  %v472_v51 = vrot.slane %v452_v47, 4  ;;  %v473_v52 = vrot.slane %v452_v47, 6  ;;  %v1483_v17 = vadd.f32 %v452_v47, %v1432_v43 }
 0x100   :  { %v487_v43 = vadd.f32 %v465_v37, %v373_v46  ;;  %v780_v37 = vrot.slane %v1508_v18, 4 }
 0x101   :  { %v1490_v54 = vadd.f32 %v471_v50, %v1435_v44  ;;  %v1493_v55 = vadd.f32 %v472_v51, %v1437_v45  ;;  %v1495_v62 = vadd.f32 %v473_v52, %v383_v57  ;;  %v1532_v50 = vld [vmem:[%s1661_s3 + $0x8] sm:$0x3f] }
 0x106   :  { %v455_v48 = vpop.f32.mrf.mxu2 }
 0x107   :  { %v1499_v59 = vadd.f32 %v455_v48, %v384_v20 }
 0x10d   :  { %v559_v0 = vpop.f32.mrf.mxu3 }
 0x10e   :  { %v457_v1 = vpop.f32.mrf.mxu2  ;;  %v579_v44 = vrot.slane %v559_v0, 4  ;;  %v580_v4 = vrot.slane %v559_v0, 6  ;;  %v1068_v9 = vrot.slane %v559_v0, 11 }
 0x10f   :  { %v782_v1 = vrot.slane %v1532_v50, 2 }
 0x110   :  { %v592_v45 = vrot.slane %v579_v44, 7  ;;  %v595_v11 = vrot.slane %v580_v4, 7 }
 0x112   :  { %v594_v10 = vrot.slane %v592_v45, 2  ;;  %v593_v20 = vsel %vm1408_vm9, %v1068_v9, %v592_v45  ;;  %v597_v23 = vrot.slane %v595_v11, 2 }
 0x113   :  { %v648_v36 = vadd.f32 %v593_v20, %v485_v56  ;;  %v781_v56 = vrot.slane %v1508_v18, 6 }
 0x114   :  { %v596_v22 = vsel %vm1408_vm9, %v594_v10, %v595_v11 }
 0x115   :  { %v561_v60 = vpop.f32.mrf.mxu3  ;;  %v649_v38 = vadd.f32 %v596_v22, %v486_v58 }
 0x116   :  { %v581_v7 = vrot.slane %v561_v60, 2  ;;  %v582_v8 = vrot.slane %v561_v60, 4  ;;  %v583_v12 = vrot.slane %v561_v60, 6  ;;  %v598_v13 = vrot.slane %v561_v60, 7 }
 0x118   :  { %v601_v15 = vrot.slane %v581_v7, 7  ;;  %v604_v16 = vrot.slane %v582_v8, 7  ;;  %v600_v27 = vrot.slane %v598_v13, 2  ;;  %v607_v3 = vrot.slane %v583_v12, 7 }
 0x119   :  { %v599_v40 = vsel %vm1408_vm9, %v597_v23, %v598_v13 }
 0x11a   :  { %v603_v32 = vrot.slane %v601_v15, 2  ;;  %v606_v33 = vrot.slane %v604_v16, 2  ;;  %v602_v42 = vsel %vm1408_vm9, %v600_v27, %v601_v15  ;;  %v609_v35 = vrot.slane %v607_v3, 2 }
 0x11b   :  { %v650_v49 = vadd.f32 %v599_v40, %v487_v43  ;;  %v651_v57 = vadd.f32 %v602_v42, %v1448_v61 }
 0x11c   :  { %v605_v46 = vsel %vm1408_vm9, %v603_v32, %v604_v16  ;;  %v608_v47 = vsel %vm1408_vm9, %v606_v33, %v607_v3  ;;  %v783_v32 = vrot.slane %v1532_v50, 4 }
 0x11d   :  { %v1501_v2 = vpop.f32.mrf.mxu3  ;;  %v652_v58 = vadd.f32 %v605_v46, %v1457_v14  ;;  %v653_v48 = vadd.f32 %v608_v47, %v1462_v25 }
 0x11e   :  { %v585_v41 = vrot.slane %v1501_v2, 6  ;;  %v610_v53 = vrot.slane %v1501_v2, 7  ;;  %v1070_v60 = vrot.slane %v1501_v2, 13 }
 0x120   :  { %v614_v44 = vrot.slane %v585_v41, 7  ;;  %v611_v14 = vsel %vm1408_vm9, %v609_v35, %v610_v53 }
 0x121   :  { %v654_v27 = vadd.f32 %v611_v14, %v1497_v63  ;;  %v1135_v63 = vld [vmem:[%s1662_s4 + $0x28] sm:$0xff] }
 0x122   :  { %v615_v16 = vsel %vm1408_vm9, %v1070_v60, %v614_v44  ;;  %v616_v33 = vrot.slane %v614_v44, 2 }
 0x125   :  { %v1503_v6 = vpop.f32.mrf.mxu3 }
 0x126   :  { %v586_v4 = vrot.slane %v1503_v6, 2  ;;  %v587_v43 = vrot.slane %v1503_v6, 4  ;;  %v588_v12 = vrot.slane %v1503_v6, 6  ;;  %v617_v13 = vrot.slane %v1503_v6, 7  ;;  %v1136_v6 = vld [vmem:[%s1662_s4 + $0x30] sm:$0xff] }
 0x127   :  { %949 = vmatpush.bf16.msrb.mxu1 %v1136_v6  ;;  %v968_v6 = vld [vmem:[%s1663_s6 + $0x38] sm:$0xff] }
 0x128   :  { %v620_v15 = vrot.slane %v586_v4, 7  ;;  %v623_v19 = vrot.slane %v587_v43, 7  ;;  %v619_v3 = vrot.slane %v617_v13, 2  ;;  %v618_v42 = vsel %vm1408_vm9, %v616_v33, %v617_v13  ;;  %985 = vmatpush.msra.mxu2 %v968_v6 }
 0x12b   :  { %950 = vmatpush.bf16.msrb.mxu1 %v1135_v63 }
 0x12d   :  { %v1518_v26 = vpop.f32.mrf.mxu3 }
 0x12e   :  { %v722_v34 = vpop.f32.mrf.mxu0  ;;  %v629_v35 = vrot.slane %v1518_v26, 7 }
 0x12f   :  { %v741_v39 = vrot.slane %v722_v34, 4  ;;  %v742_v5 = vrot.slane %v722_v34, 6  ;;  %v626_v34 = vrot.slane %v588_v12, 7 }
 0x131   :  { %v761_v28 = vadd.f32 %v741_v39, %v648_v36  ;;  %v762_v29 = vadd.f32 %v742_v5, %v649_v38  ;;  %v655_v36 = vadd.f32 %v615_v16, %v1465_v30  ;;  %v622_v39 = vrot.slane %v620_v15, 2  ;;  %v1131_v16 = vld [vmem:[%s1662_s4 + $0x8] sm:$0xff] }
 0x132   :  { %v625_v5 = vrot.slane %v623_v19, 2  ;;  %v621_v30 = vsel %vm1408_vm9, %v619_v3, %v620_v15 }
 0x133   :  { %v789_v51 = vadd.f32 %v1508_v18, %v761_v28  ;;  %v790_v52 = vadd.f32 %v779_v24, %v762_v29  ;;  %v624_v47 = vsel %vm1408_vm9, %v622_v39, %v623_v19  ;;  %v964_v39 = vld [vmem:[%s1663_s6 + $0x18] sm:$0xff] }
 0x135   :  { %817 = vst [vmem:[#allocation1] ss:$4 sm:$0xff] %v789_v51  ;;  %v571_v0 = vpop.f32.mrf.mxu3  ;;  %v627_v51 = vsel %vm1408_vm9, %v625_v5, %v626_v34 }
 0x136   :  { %819 = vst [vmem:[#allocation1 + $0x1] ss:$4 sm:$0xff] %v790_v52  ;;  %v724_v45 = vpop.f32.mrf.mxu0  ;;  %v1134_v52 = vld [vmem:[%s1662_s4 + $0x20] sm:$0xff]  ;;  %v659_v0 = vadd.f32 %v627_v51, %v1493_v55 }
 0x137   :  { %v743_v7 = vrot.slane %v724_v45, 2  ;;  %v744_v8 = vrot.slane %v724_v45, 4  ;;  %v745_v9 = vrot.slane %v724_v45, 6  ;;  %v763_v61 = vadd.f32 %v724_v45, %v650_v49  ;;  %951 = vmatpush.bf16.msrb.mxu1 %v1134_v52 }
 0x138   :  { %v656_v49 = vadd.f32 %v618_v42, %v1467_v31  ;;  %v1071_v31 = vrot.slane %v1518_v26, 9 }
 0x139   :  { %v764_v25 = vadd.f32 %v743_v7, %v651_v57  ;;  %v765_v10 = vadd.f32 %v744_v8, %v652_v58  ;;  %v766_v11 = vadd.f32 %v745_v9, %v653_v48  ;;  %v791_v2 = vadd.f32 %v780_v37, %v763_v61  ;;  %v1133_v7 = vld [vmem:[%s1662_s4 + $0x18] sm:$0xff] }
 0x13a   :  { %v628_v57 = vrot.slane %v626_v34, 2  ;;  %v657_v58 = vadd.f32 %v621_v30, %v1483_v17  ;;  %v658_v48 = vadd.f32 %v624_v47, %v1490_v54  ;;  %v631_v8 = vrot.slane %v629_v35, 2  ;;  %v1143_v30 = vld [vmem:[%s1659_s2] ss:$0 sm:$0xff] }
 0x13b   :  { %v792_v20 = vadd.f32 %v781_v56, %v764_v25  ;;  %v793_v22 = vadd.f32 %v1532_v50, %v765_v10  ;;  %821 = vst [vmem:[#allocation1 + $0x2] ss:$4 sm:$0xff] %v791_v2  ;;  %v794_v23 = vadd.f32 %v782_v1, %v766_v11  ;;  %952 = vmatpush.bf16.msrb.mxu1 %v1133_v7 }
 0x13c   :  { %v630_v55 = vsel %vm1408_vm9, %v628_v57, %v629_v35  ;;  %v633_v2 = vsel %vm1408_vm9, %v631_v8, %v1071_v31 }
 0x13d   :  { %823 = vst [vmem:[#allocation1 + $0x3] ss:$4 sm:$0xff] %v792_v20  ;;  %v660_v13 = vadd.f32 %v630_v55, %v1495_v62 }
 0x13e   :  { %825 = vst [vmem:[#allocation1 + $0x20] ss:$4 sm:$0xff] %v793_v22  ;;  %v727_v38 = vpop.f32.mrf.mxu0 }
 0x13f   :  { %v746_v28 = vrot.slane %v727_v38, 6  ;;  %v767_v29 = vadd.f32 %v727_v38, %v654_v27  ;;  %827 = vst [vmem:[#allocation1 + $0x21] ss:$4 sm:$0xff] %v794_v23 }
 0x141   :  { %v768_v40 = vadd.f32 %v746_v28, %v655_v36  ;;  %v795_v41 = vadd.f32 %v783_v32, %v767_v29  ;;  %v965_v36 = vld [vmem:[%s1663_s6 + $0x20] sm:$0xff]  ;;  %v963_v29 = vld [vmem:[%s1663_s6 + $0x10] sm:$0xff] }
 0x143   :  { %v796_v46 = vadd.f32 %v1508_v18, %v768_v40  ;;  %829 = vst [vmem:[#allocation1 + $0x22] ss:$4 sm:$0xff] %v795_v41  ;;  %v661_v18 = vadd.f32 %v633_v2, %v1499_v59  ;;  %v1130_v59 = vld [vmem:[%s1662_s4] sm:$0xff]  ;;  %v962_v40 = vld [vmem:[%s1663_s6 + $0x8] sm:$0xff] }
 0x144   :  { %v830_v53 = vld.sshfl [vmem:[#allocation1] sm:$0xff pattern:$0x73625140] }
 0x145   :  { %832 = vst [vmem:[#allocation1] ss:$4 sm:$0xff] %v796_v46  ;;  %v961_v46 = vld [vmem:[%s1663_s6] sm:$0xff] }
 0x146   :  { %v729_v60 = vpop.f32.mrf.mxu0 }
 0x147   :  { %v747_v44 = vrot.slane %v729_v60, 2  ;;  %v748_v4 = vrot.slane %v729_v60, 4  ;;  %v749_v43 = vrot.slane %v729_v60, 6  ;;  %v769_v45 = vadd.f32 %v729_v60, %v656_v49 }
 0x149   :  { %v770_v9 = vadd.f32 %v747_v44, %v657_v58  ;;  %v771_v17 = vadd.f32 %v748_v4, %v658_v48  ;;  %v772_v61 = vadd.f32 %v749_v43, %v659_v0  ;;  %v797_v54 = vadd.f32 %v779_v24, %v769_v45  ;;  %v1132_v24 = vld [vmem:[%s1662_s4 + $0x10] sm:$0xff]  ;;  %v1144_v45 = vld [vmem:[%s1660_s5] ss:$0 sm:$0xff] }
 0x14a   :  { %v831_v14 = vld.sshfl [vmem:[#allocation1 + $0x20] sm:$0xff pattern:$0x73625140]  ;;  %953 = vmatpush.bf16.msrb.mxu1 %v1132_v24 }
 0x14b   :  { %v798_v25 = vadd.f32 %v780_v37, %v770_v9  ;;  %v799_v10 = vadd.f32 %v781_v56, %v771_v17  ;;  %v800_v11 = vadd.f32 %v1532_v50, %v772_v61  ;;  %v846_v26 = vsel %vm845_vm10, %v831_v14, -inf  ;;  %833 = vst [vmem:[#allocation1 + $0x1] ss:$4 sm:$0xff] %v797_v54  ;;  %v967_v50 = vld [vmem:[%s1663_s6 + $0x30] sm:$0xff]  ;;  %v1145_v9 = vld [vmem:[%s1664_s7] ss:$0 sm:$0xff] }
 0x14c   :  { %v847_v12 = vmax.f32 %v830_v53, %v846_v26  ;;  %986 = vmatpush.msra.mxu2 %v967_v50 }
 0x14d   :  { %836 = vst [vmem:[#allocation1 + $0x20] ss:$4 sm:$0xff] %v800_v11 }
 0x14e   :  { %v732_v37 = vpop.f32.mrf.mxu0  ;;  %834 = vst [vmem:[#allocation1 + $0x2] ss:$4 sm:$0xff] %v798_v25  ;;  %v848_v19 = vrot.slane %v847_v12, 4  ;;  %954 = vmatpush.bf16.msrb.mxu1 %v1131_v16 }
 0x14f   :  { %v750_v56 = vrot.slane %v732_v37, 2  ;;  %v773_v15 = vadd.f32 %v732_v37, %v660_v13  ;;  %835 = vst [vmem:[#allocation1 + $0x3] ss:$4 sm:$0xff] %v799_v10 }
 0x150   :  { %v849_v22 = vmax.f32 %v847_v12, %v848_v19 }
 0x151   :  { %v774_v20 = vadd.f32 %v750_v56, %v661_v18  ;;  %v801_v21 = vadd.f32 %v782_v1, %v773_v15  ;;  %v966_v1 = vld [vmem:[%s1663_s6 + $0x28] sm:$0xff] }
 0x152   :  { %955 = vmatpush.bf16.msrb.mxu1 %v1130_v59  ;;  %v850_v27 = vrot.slane %v849_v22, 2  ;;  %987 = vmatpush.msra.mxu2 %v966_v1 }
 0x153   :  { %v802_v62 = vadd.f32 %v783_v32, %v774_v20  ;;  %837 = vst [vmem:[#allocation1 + $0x21] ss:$4 sm:$0xff] %v801_v21 }
 0x154   :  { %v851_v33 = vmax.f32 %v849_v22, %v850_v27  ;;  %988 = vmatpush.msra.mxu2 %v965_v36 }
 0x155   :  { %838 = vst [vmem:[#allocation1 + $0x22] ss:$4 sm:$0xff] %v802_v62 }
 0x156   :  { %v734_v23 = vpop.f32.mrf.mxu0  ;;  %v839_v34 = vld.sshfl [vmem:[#allocation1] sm:$0xff pattern:$0x73625140]  ;;  %v852_v5 = vrot.slane %v851_v33, 1  ;;  %989 = vmatpush.msra.mxu2 %v964_v39 }
 0x158   :  { %v853_v41 = vmax.f32 %v851_v33, %v852_v5  ;;  %990 = vmatpush.msra.mxu2 %v963_v29 }
 0x15a   :  { %991 = vmatpush.msra.mxu2 %v962_v40  ;;  %v866_v52 = vadd.f32 %v1143_v30, %v853_v41 }
 0x15c   :  { %v840_v32 = vld.sshfl [vmem:[#allocation1 + $0x20] sm:$0xff pattern:$0x73625140]  ;;  %992 = vmatpush.msra.mxu2 %v961_v46  ;;  %v868_v49 = vmax.f32 %v866_v52, 0.0 }
 0x15d   :  { %v854_v3 = vsel %vm845_vm10, %v840_v32, -inf }
 0x15e   :  { %v855_v38 = vmax.f32 %v839_v34, %v854_v3  ;;  %v870_v58 = vpack.c.bf16 %v868_v49, %v868_v49 }
 0x160   :  { %v856_v28 = vrot.slane %v855_v38, 4  ;;  %v894_v60 = vunpack.c.l.b16 %v870_v58 }
 0x162   :  { %v857_v63 = vmax.f32 %v855_v38, %v856_v28 }
 0x164   :  { %v858_v42 = vrot.slane %v857_v63, 2 }
 0x166   :  { %v859_v47 = vmax.f32 %v857_v63, %v858_v42 }
 0x168   :  { %v860_v51 = vrot.slane %v859_v47, 1 }
 0x16a   :  { %v861_v35 = vmax.f32 %v859_v47, %v860_v51 }
 0x16c   :  { %v867_v53 = vadd.f32 %v1143_v30, %v861_v35 }
 0x16e   :  { %v869_v57 = vmax.f32 %v867_v53, 0.0 }
 0x170   :  { %v871_v48 = vpack.c.bf16 %v869_v57, %v869_v57 }
 0x172   :  { %v895_v0 = vunpack.c.l.b16 %v871_v48 }
 0x174   :  { %v896_v44 = vrot.slane %v895_v0, 7 }
 0x176   :  { %v897_v4 = vsel %vm52_vm1, %v896_v44, %v894_v60 }
 0x177   :  { %v898_v43 = vpack.c.b16 %v897_v4, %v897_v4 }
 0x179   :  { %956 = vmatmul.bf16.vlgmr.msrb.gmra.mxu1 %v898_v43 }
 0x1f6   :  { %v957_v7 = vpop.f32.mrf.mxu1 }
 0x1f7   :  { %v958_v8 = vadd.f32 %v1144_v45, %v957_v7 }
 0x1f9   :  { %1119 = vmatmul.msk.f32.vlgmr.msra.gmra.mxu2 %vm973_vm11, %v958_v8 }
 0x1fe   :  { %v959_v31 = vpop.f32.mrf.mxu1 }
 0x27c   :  { %v994_v17 = vpop.f32.mrf.mxu2 }
 0x27d   :  { %v995_v61 = vadd.f32 %v1145_v9, %v994_v17 }
 0x27f   :  { %998 = vrot.lane.b32.xlu0 %v995_v61, %s1146_s26 }
 0x2f1   :  { %v999_v54 = vpop.permute.xlu0 %998 }
 0x2f2   :  { %v1001_v55 = vsel %vm973_vm11, %v958_v8, %v999_v54 }
 0x2f3   :  { %1002 = vst [vmem:[%s1665_s8] sm:$0x3] %v1001_v55 }

</bundles_post_ra>
